<compile_context>
chip_gen: v7x
topology: tpu7x:2x2x1
jax: 0.10.0
libtpu: 0.0.40
codegen_flags: <defaults>
</compile_context>

<pallas_src>
import math

import jax
import jax.numpy as jnp
from jax.experimental import pallas as pl
from jax.experimental.pallas import tpu as pltpu


# ---------------------------------------------------------------------------
# Parameter setup (matches torch __init__). Build pe at the model dtype once so
# the forward path never pays a recurring cast of the whole table.
# ---------------------------------------------------------------------------
def make_positional_encoding(d_model: int, max_len: int,
                             dtype=jnp.float32) -> jnp.ndarray:
    position = jnp.arange(0.0, max_len, dtype=jnp.float32)[:, None]        # (L, 1)
    div_term = jnp.exp(
        jnp.arange(0.0, d_model, 2.0, dtype=jnp.float32)
        * (-(math.log(10000.0) / float(d_model)))
    )                                                                       # (ceil(D/2),)
    ang = position * div_term                                               # (L, ceil(D/2))
    pe = jnp.zeros((max_len, d_model), dtype=jnp.float32)
    pe = pe.at[:, 0::2].set(jnp.sin(ang))
    # PyTorch errors for odd d_model; slicing keeps odd D well-defined here.
    pe = pe.at[:, 1::2].set(jnp.cos(ang)[:, : d_model // 2])
    return pe[None, :, :].astype(dtype)                                     # (1, L, D)


# ---------------------------------------------------------------------------
# Kernel: elementwise add; pe block has leading dim 1 and broadcasts over the
# folded batch rows of the x/out block.
# ---------------------------------------------------------------------------
def _add_pe_kernel(x_ref, pe_ref, o_ref):
    o_ref[...] = (x_ref[...] + pe_ref[...]).astype(o_ref.dtype)


# ---------------------------------------------------------------------------
# Block-size selection.
# ---------------------------------------------------------------------------
def _vmem_target_bytes() -> int:
    """Per-x-block byte target, generation-aware.

    Footprint ~= 6 blocks (x + out double-buffered, pe double-buffered and no
    larger than an x block).  Keep that under ~60% of physical VMEM:
    v7x (64 MiB)  -> ~6 MiB blocks;  v5e/v6e (128 MiB) -> clamped to 8 MiB.
    """
    try:
        vmem = int(pltpu.get_tpu_info().vmem_capacity_bytes)
    except Exception:
        vmem = 64 * 1024 * 1024  # conservative (v7x per-core)
    return int(max(2 << 20, min(8 << 20, (vmem * 6 // 10) // 6)))


def _largest_aligned_divisor(n: int, align: int, cap: int) -> int:
    """Largest divisor of n that is a multiple of `align` and <= cap (0 if none)."""
    best, d = 0, 1
    while d * d <= n:
        if n % d == 0:
            for c in (d, n // d):
                if c <= cap and c % align == 0 and c > best:
                    best = c
        d += 1
    return best


def _pick_3d_tiles(B: int, L: int, D: int, itemsize: int, target: int):
    """(bb, tl): batch rows and sequence rows per block for the (bb, tl, D) path."""
    # Packed-sublane rows per vreg: 8 for f32, 16 for bf16, 32 for int8/fp8.
    sub = max(8, 32 // itemsize)
    row_bytes = D * itemsize
    cap_rows = max(1, target // row_bytes)
    if L <= cap_rows:
        tl = L                                           # full dim: always legal
    else:
        tl = _largest_aligned_divisor(L, sub, cap_rows)  # divisor -> no partial block
        if not tl:
            tl = max(sub, (cap_rows // sub) * sub)       # partial last block (masked)
    blk = tl * row_bytes
    cap_b = max(1, target // blk)
    if B <= cap_b:
        bb = B
    else:
        bb_div = _largest_aligned_divisor(B, 1, cap_b)
        bb = bb_div if bb_div * 2 >= cap_b else cap_b    # prefer divisors, not tiny ones
    return bb, tl


def _pick_2d_tiles(B: int, N: int, itemsize: int, target: int):
    """(bb, tn) for the flattened (B, N) path: keep the lane axis wide, tile batch."""
    row = N * itemsize
    if B * row <= target:
        return B, N
    if B >= 8:
        cap_b = max(1, target // row)
        bb = (cap_b // 8) * 8                            # sublane-legal batch tile
        if bb >= 8:
            bb_div = _largest_aligned_divisor(B, 8, bb)
            return (bb_div if bb_div else bb), N
        bb = 8
    else:
        bb = B
    # Even bb full-width rows exceed the target -> tile the lane axis too.
    cap_n = max(128, (target // (bb * itemsize)) // 128 * 128)
    if N <= cap_n:
        return bb, N
    tn = _largest_aligned_divisor(N, 128, cap_n) or cap_n
    return bb, tn


def _vmem_limit(x_blk_bytes: int, pe_blk_bytes: int) -> int:
    # x and out blocks double-buffered, pe double-buffered, + compiler scratch.
    return int(max(2 * (2 * x_blk_bytes + pe_blk_bytes) + (4 << 20), 16 << 20))


# ---------------------------------------------------------------------------
# Forward wrapper.
# ---------------------------------------------------------------------------
def positional_encoding_forward(x: jnp.ndarray, pe: jnp.ndarray,
                                *, target_tile_bytes: int | None = None
                                ) -> jnp.ndarray:
    """x: (B, L, D), pe: (1, L, D) -> (B, L, D)."""
    B, L, D = x.shape
    assert pe.shape == (1, L, D), f"pe shape {pe.shape} != (1, {L}, {D})"
    if pe.dtype != x.dtype:
        # Fallback only: build pe at the model dtype in make_positional_encoding
        # so this extra full-table read/write never runs in steady state.
        pe = pe.astype(x.dtype)
    itemsize = jnp.dtype(x.dtype).itemsize
    target = target_tile_bytes or _vmem_target_bytes()
    cost = pl.CostEstimate(
        flops=B * L * D,
        transcendentals=0,
        bytes_accessed=(2 * B * L * D + L * D) * itemsize,
    )

    if D % 128 == 0:
        # --- 3D path: lane dim already dense; tile L and fold batch rows. ----
        bb, tl = _pick_3d_tiles(B, L, D, itemsize, target)
        x_blk = bb * tl * D * itemsize
        pe_blk = tl * D * itemsize
        # batch innermost -> pe block index constant across consecutive steps
        # -> pe fetched once per L-tile, not per (b, l).
        grid = (pl.cdiv(L, tl), pl.cdiv(B, bb))
        return pl.pallas_call(
            _add_pe_kernel,
            out_shape=jax.ShapeDtypeStruct((B, L, D), x.dtype),
            grid_spec=pltpu.PrefetchScalarGridSpec(
                num_scalar_prefetch=0,
                grid=grid,
                in_specs=[
                    pl.BlockSpec((bb, tl, D), lambda l, b: (b, l, 0)),
                    pl.BlockSpec((1, tl, D), lambda l, b: (0, l, 0)),
                ],
                out_specs=pl.BlockSpec((bb, tl, D), lambda l, b: (b, l, 0)),
            ),
            compiler_params=pltpu.CompilerParams(
                dimension_semantics=("parallel", "parallel"),
                vmem_limit_bytes=_vmem_limit(x_blk, pe_blk),
            ),
            cost_estimate=cost,
        )(x, pe)

    # --- 2D path (D not lane-aligned): flatten (L, D) -> N, lane-dense slabs. -
    N = L * D
    x2 = x.reshape(B, N)
    pe2 = pe.reshape(1, N)
    bb, tn = _pick_2d_tiles(B, N, itemsize, target)
    x_blk = bb * tn * itemsize
    pe_blk = tn * itemsize
    grid = (pl.cdiv(N, tn), pl.cdiv(B, bb))              # batch innermost: pe reuse
    out2 = pl.pallas_call(
        _add_pe_kernel,
        out_shape=jax.ShapeDtypeStruct((B, N), x.dtype),
        grid_spec=pltpu.PrefetchScalarGridSpec(
            num_scalar_prefetch=0,
            grid=grid,
            in_specs=[
                pl.BlockSpec((bb, tn), lambda n, b: (b, n)),
                pl.BlockSpec((1, tn), lambda n, b: (0, n)),
            ],
            out_specs=pl.BlockSpec((bb, tn), lambda n, b: (b, n)),
        ),
        compiler_params=pltpu.CompilerParams(
            dimension_semantics=("parallel", "parallel"),
            vmem_limit_bytes=_vmem_limit(x_blk, pe_blk),
        ),
        cost_estimate=cost,
    )(x2, pe2)
    return out2.reshape(B, L, D)


# ---------------------------------------------------------------------------
# Self-test.
# ---------------------------------------------------------------------------
if __name__ == "__main__":
    # 1) Small shape consistent with the module's forward (2D / flattened path).
    B, max_len, d_model = 2, 8, 32
    x = jax.random.normal(jax.random.PRNGKey(0), (B, max_len, d_model),
                          dtype=jnp.float32)
    pe = make_positional_encoding(d_model, max_len)
    out = jax.block_until_ready(positional_encoding_forward(x, pe))
    assert out.shape == (B, max_len, d_model)
    assert jnp.allclose(out, x + pe, atol=1e-6), "mismatch (2D path)"

    # 2) Lane-dense 3D path at the module's default max_len.
    B2, L2, D2 = 2, 49, 128
    x2 = jax.random.normal(jax.random.PRNGKey(1), (B2, L2, D2), dtype=jnp.float32)
    pe2 = make_positional_encoding(D2, L2)
    out2 = jax.block_until_ready(positional_encoding_forward(x2, pe2))
    assert jnp.allclose(out2, x2 + pe2, atol=1e-6), "mismatch (3D path)"

    # 3) bf16 3D path (dtype-aware tiling; pe built at the model dtype, no cast).
    B3, L3, D3 = 4, 64, 256
    x3 = jax.random.normal(jax.random.PRNGKey(2), (B3, L3, D3),
                           dtype=jnp.bfloat16)
    pe3 = make_positional_encoding(D3, L3, dtype=jnp.bfloat16)
    out3 = jax.block_until_ready(positional_encoding_forward(x3, pe3))
    assert jnp.allclose(out3.astype(jnp.float32),
                        (x3 + pe3).astype(jnp.float32), atol=1e-2), "mismatch (bf16)"

    # 4) Force a multi-block grid with partial last L-block (masking correctness).
    B4, L4, D4 = 3, 44, 128
    x4 = jax.random.normal(jax.random.PRNGKey(3), (B4, L4, D4), dtype=jnp.float32)
    pe4 = make_positional_encoding(D4, L4)
    out4 = jax.block_until_ready(
        positional_encoding_forward(x4, pe4, target_tile_bytes=16 * 1024))
    assert jnp.allclose(out4, x4 + pe4, atol=1e-6), "mismatch (tiled / partial block)"

    print("KERNEL_OK")
</pallas_src>

<mosaic_0001>
module attributes {stable_mosaic.version = 11 : i64} {
  func.func @_add_pe_kernel(%arg0: i32, %arg1: i32, %arg2: memref<2x256xf32, #tpu.memory_space<vmem>>, %arg3: memref<1x256xf32, #tpu.memory_space<vmem>>, %arg4: memref<2x256xf32, #tpu.memory_space<vmem>>) attributes {dimension_semantics = [#tpu.dimension_semantics<parallel>, #tpu.dimension_semantics<parallel>], iteration_bounds = array<i64: 1, 1>, scalar_prefetch = 0 : i64, scratch_operands = 0 : i64, tpu.core_type = #tpu.core_type<tc>, window_params = [{transform_indices = @transform_0, window_bounds = array<i64: 2, 256>}, {transform_indices = @transform_1, window_bounds = array<i64: 1, 256>}, {transform_indices = @transform_2, window_bounds = array<i64: 2, 256>}]} {
    %c0 = arith.constant 0 : index
    %c0_0 = arith.constant 0 : index
    %0 = vector.load %arg2[%c0, %c0_0] : memref<2x256xf32, #tpu.memory_space<vmem>>, vector<2x256xf32>
    %c0_1 = arith.constant 0 : index
    %c0_2 = arith.constant 0 : index
    %1 = vector.load %arg3[%c0_1, %c0_2] : memref<1x256xf32, #tpu.memory_space<vmem>>, vector<1x256xf32>
    %2 = vector.broadcast %1 : vector<1x256xf32> to vector<2x256xf32>
    %3 = arith.addf %0, %2 : vector<2x256xf32>
    %c0_3 = arith.constant 0 : index
    %c0_4 = arith.constant 0 : index
    %4 = vector.load %arg4[%c0_3, %c0_4] : memref<2x256xf32, #tpu.memory_space<vmem>>, vector<2x256xf32>
    tpu.vector_store %arg4[%c0_3, %c0_4], %3 {strides = array<i32>} : memref<2x256xf32, #tpu.memory_space<vmem>>, vector<2x256xf32>,
    return
  }
  func.func @transform_0(%arg0: i32, %arg1: i32) -> (i32, i32) {
    %c0_i32 = arith.constant 0 : i32
    return %arg1, %arg0 : i32, i32
  }
  func.func @transform_1(%arg0: i32, %arg1: i32) -> (i32, i32) {
    %c0_i32 = arith.constant 0 : i32
    %c0_i32_0 = arith.constant 0 : i32
    return %c0_i32, %arg0 : i32, i32
  }
  func.func @transform_2(%arg0: i32, %arg1: i32) -> (i32, i32) {
    %c0_i32 = arith.constant 0 : i32
    return %arg1, %arg0 : i32, i32
  }
}

</mosaic_0001>

<bundles_post_ra>
// kernel: tpu_custom_call.1
= control target key start
LH: loop header
LB: loop body
LE: loop exit
PB: predicated region body
PF: predicated region fallthrough
CT: control target
= control target key end

     0   :  { %7 = vsyncpa [#allocation3], 0  ;;  %s157_s0 = inlined_call_operand.hbm [shape: f32[2,256], index: 0, kind: input, shape index: {}]   ;;  %s158_s1 = inlined_call_operand.vmem [shape: f32[1,256], index: 1, kind: input, shape index: {}]   ;;  %s159_s2 = inlined_call_operand.hbm [shape: f32[2,256], index: 2, kind: output, shape index: {}]  }
   0x1   :  { %8 = vsyncpa [#allocation4], 0  ;;  %s112_s9 = smov [#allocation2]   ;;  %s64_s13 = scalar_lea.hbm %s157_s0, 64 }
   0x2   :  { %s15_s10 = sshll.u32 %s112_s9, 4  ;;  %p65_p0 = scmp.ne.s32.totalorder %s157_s0, %s64_s13  ;;  %s16_s10 = int_to_ptr.vmem [resolvable:$true] %s15_s10 }
   0x3   :  { %p68_p1 = scmp.lt.u32.totalorder %s64_s13, %s157_s0 }
   0x5   :  { %p70_p2 = pnand %p68_p1, %p65_p0 }
   0x7   :  { %73 = shalt.err (!%p70_p2)
}
   0x8   :  { %s74_s18 = scalar_lea.vmem %s16_s10, 64  ;;  %p79_p4 = scmp.lt.s32.totalorder %s16_s10, %s16_s10 }
   0x9   :  { %p75_p3 = scmp.ne.s32.totalorder %s16_s10, %s74_s18  ;;  %p80_p5 = scmp.lt.s32.totalorder %s74_s18, %s74_s18 }
   0xb   :  { %p81_p6 = por %p80_p5, %p79_p4 }
   0xd   :  { %p82_p7 = pnand %p81_p6, %p75_p3 }
   0xf   :  { %85 = shalt.err (!%p82_p7)
}
  0x10   :  { %18 = dma.hbm_to_vmem [thread:$0]  %s157_s0, 64, %s16_s10, [#allocation3]  }
  0x11   :  { %108 = dma.done.wait [#allocation3], 64  }
  0x12   :  { %109 = vsyncadd [#allocation3], 4294967232  ;;  %v27_v0 = vlaneseq  ;;  %v113_v1 = vmov 1983009808   ;;  %v25_v7 = vld [vmem:[%s158_s1] sm:$0x3] }
  0x13   :  { %v37_v2 = vunpack.c.l.s4 %v113_v1  ;;  %v24_v12 = vld [vmem:[#allocation2] sm:$0xf]  ;;  %s114_s23 = smov [#allocation5]  }
  0x14   :  { %v28_v3 = vshrl.u32 %v27_v0, 7  ;;  %s52_s0 = sshll.u32 %s114_s23, 4  ;;  %s53_s0 = int_to_ptr.vmem [resolvable:$true] %s52_s0 }
  0x15   :  { %v38_v6 = vunpack.c.0.s8 %v37_v2  ;;  %s86_s24 = scalar_lea.vmem %s53_s0, 64  ;;  %p91_p9 = scmp.lt.s32.totalorder %s53_s0, %s53_s0 }
  0x16   :  { %v29_v4 = vsub.s32 0, %v28_v3  ;;  %v33_v5 = vsub.s32 1, %v28_v3  ;;  %p87_p8 = scmp.ne.s32.totalorder %s53_s0, %s86_s24  ;;  %p92_p10 = scmp.lt.s32.totalorder %s86_s24, %s86_s24 }
  0x17   :  { %v41_v10 = vsub.s32 %v38_v6, %v28_v3 }
  0x18   :  { %v30_v8 = vrot.slane %v25_v7, %v29_v4  ;;  %v34_v9 = vrot.slane %v25_v7, %v33_v5  ;;  %p93_p11 = por %p92_p10, %p91_p9 }
  0x1a   :  { %v35_v11 = vcombine.low %v30_v8, %v34_v9  ;;  %p94_p12 = pnand %p93_p11, %p87_p8 }
  0x1c   :  { %v42_v13 = vrot.slane %v35_v11, %v41_v10 }
  0x1e   :  { %v44_v14 = vadd.f32 %v42_v13, %v24_v12 }
  0x20   :  { %45 = vst [vmem:[#allocation5] sm:$0xf] %v44_v14 }
  0x21   :  { %97 = shalt.err (!%p94_p12)
}
  0x22   :  { %s98_s26 = scalar_lea.hbm %s159_s2, 64 }
  0x23   :  { %p99_p13 = scmp.ne.s32.totalorder %s159_s2, %s98_s26  ;;  %p102_p0 = scmp.lt.u32.totalorder %s98_s26, %s159_s2 }
  0x25   :  { %p104_p1 = pnand %p102_p0, %p99_p13 }
  0x27   :  { %107 = shalt.err (!%p104_p1)
}
  0x28   :  { %55 = dma.vmem_to_hbm [thread:$0]  %s53_s0, 64, %s159_s2, [#allocation4]  }
  0x29   :  { %110 = dma.done.wait [#allocation4], 64  }
  0x2a   :  { %111 = vsyncadd [#allocation4], 4294967232 }
  0x2b   :  { %59 = vsyncpa [#allocation3], 1 }
  0x2c   :  { %60 = vsyncpa [#allocation4], 1 }

</bundles_post_ra>
